<compile_context>
chip_gen: v5e
topology: v5e:2x2
jax: 0.10.0
libtpu: 0.0.40
codegen_flags: <defaults>
</compile_context>

<pallas_src>
import functools

import jax
import jax.numpy as jnp
from jax.experimental import pallas as pl
from jax.experimental.pallas import tpu as pltpu

HIDDEN = 128


def dqn_kernel(x_ref, w1_ref, b1_ref, w2_ref, b2_ref, w3_ref, b3_ref, o_ref):
    cdt = w1_ref.dtype  # compute dtype (f32 or bf16)
    # Layer 1: (TB, D) @ (D, 128) + (1, 128) -> ReLU
    # (MXU accumulates in f32 internally even when cdt is bf16; emitting bf16
    #  directly avoids two full-tile cast passes on the VPU.)
    h1 = jnp.dot(x_ref[...], w1_ref[...], preferred_element_type=cdt)
    h1 = jnp.maximum(h1 + b1_ref[...], 0.0)
    # Layer 2: (TB, 128) @ (128, 128) + (1, 128) -> ReLU
    h2 = jnp.dot(h1, w2_ref[...], preferred_element_type=cdt)
    h2 = jnp.maximum(h2 + b2_ref[...], 0.0)
    # Layer 3: (TB, 128) @ (128, A_pad) + (1, A_pad)   (f32 accumulate, no act)
    out = jnp.dot(h2, w3_ref[...], preferred_element_type=jnp.float32)
    out = out + b3_ref[...]
    o_ref[...] = out.astype(o_ref.dtype)


def _round_up(v: int, m: int) -> int:
    return ((v + m - 1) // m) * m


def prepare_params(params, *, use_bf16: bool = False):
    """One-time weight preparation: pad layer-3 to a lane-dense 128 and cast.

    Hoisted out of the per-call forward so RL loops don't re-pad / re-cast
    weights every environment step.
    Returns (prepared_params, num_actions).
    """
    w1, b1, w2, b2, w3, b3 = params
    A = w3.shape[1]
    A_pad = max(128, _round_up(A, 128))
    w3p = jnp.pad(w3, ((0, 0), (0, A_pad - A)))
    b3p = jnp.pad(b3, ((0, 0), (0, A_pad - A)))

    cdt = jnp.bfloat16 if use_bf16 else jnp.float32
    prepared = (
        w1.astype(cdt), b1.astype(cdt),
        w2.astype(cdt), b2.astype(cdt),
        w3p.astype(cdt), b3p.astype(jnp.float32),  # layer-3 bias stays f32
    )
    return prepared, A


def _choose_tile(B: int, sub: int, block_b: int, min_tiles: int = 2):
    """Pick batch tile TB (multiple of `sub`) and padded batch B_pad.

    Ensures >= `min_tiles` tiles when the batch is large enough so v7x's two
    TensorCores both get work (harmless on v5e/v6e: 1 TC)."""
    B_min = max(sub, _round_up(B, sub))
    TB = min(_round_up(block_b, sub), B_min)
    if B_min >= min_tiles * sub and pl.cdiv(B_min, TB) < min_tiles:
        TB = _round_up(pl.cdiv(B_min, min_tiles), sub)
    B_pad = _round_up(B_min, TB)
    return TB, B_pad


@functools.partial(jax.jit,
                   static_argnames=("num_actions", "block_b", "use_bf16"))
def dqn_forward(x, prepared_params, num_actions, *, block_b: int = 512,
                use_bf16: bool = False):
    """Forward pass of the DQN MLP for x of shape (B, obs_dim).

    `prepared_params` must come from prepare_params(..., use_bf16=use_bf16).
    """
    w1c, b1c, w2c, b2c, w3c, b3c = prepared_params
    B, D = x.shape
    H = w1c.shape[1]
    A_pad = w3c.shape[1]
    A = num_actions

    compute_dtype = jnp.bfloat16 if use_bf16 else jnp.float32
    # bf16 output halves the (heavily padded) output writeback; the useful
    # [:B, :A] slice is cast back to f32 afterwards.
    out_dtype = compute_dtype
    c_itemsize = jnp.dtype(compute_dtype).itemsize

    # Batch tiling: sublane multiple of 16 for bf16 (packed (16,128) tiles),
    # 8 for f32.
    sub = 16 if use_bf16 else 8
    TB, B_pad = _choose_tile(B, sub, block_b)
    num_tiles = B_pad // TB

    x_p = jnp.pad(x, ((0, B_pad - B), (0, 0))).astype(compute_dtype)

    # Weights/biases: full block, constant index_map -> VMEM-resident.
    const_spec = lambda arr: pl.BlockSpec(arr.shape, lambda i: (0,) * arr.ndim)

    cost = pl.CostEstimate(
        flops=2 * B_pad * (D * H + H * H + H * A_pad),
        transcendentals=0,
        bytes_accessed=(x_p.size * c_itemsize
                        + (w1c.size + w2c.size + w3c.size) * c_itemsize
                        + (b1c.size + b2c.size) * c_itemsize + b3c.size * 4
                        + B_pad * A_pad * jnp.dtype(out_dtype).itemsize),
    )

    # Scoped-VMEM estimate: double-buffered x/out tiles + (double-buffered)
    # weights + strip-mined intermediates.  Floor at 32 MiB (raises v5e's
    # 16 MiB default), cap at 64 MiB (v7x physical VMEM per core).
    w_bytes = (w1c.size + w2c.size + w3c.size) * c_itemsize
    b_bytes = (b1c.size + b2c.size) * c_itemsize + b3c.size * 4
    vmem_est = (2 * TB * D * c_itemsize
                + 2 * TB * A_pad * jnp.dtype(out_dtype).itemsize
                + 2 * (w_bytes + b_bytes)
                + 3 * TB * H * 4)
    vmem_limit = int(min(64 << 20, max(32 << 20, 2 * vmem_est)))

    out_padded = pl.pallas_call(
        dqn_kernel,
        out_shape=jax.ShapeDtypeStruct((B_pad, A_pad), out_dtype),
        grid_spec=pltpu.PrefetchScalarGridSpec(
            num_scalar_prefetch=0,
            grid=(num_tiles,),
            in_specs=[
                pl.BlockSpec((TB, D), lambda i: (i, 0)),   # x: batch-tiled
                const_spec(w1c), const_spec(b1c),
                const_spec(w2c), const_spec(b2c),
                const_spec(w3c), const_spec(b3c),
            ],
            out_specs=pl.BlockSpec((TB, A_pad), lambda i: (i, 0)),
        ),
        compiler_params=pltpu.CompilerParams(
            dimension_semantics=("parallel",),
            vmem_limit_bytes=vmem_limit,
        ),
        cost_estimate=cost,
    )(x_p, w1c, b1c, w2c, b2c, w3c, b3c)

    return out_padded[:B, :A].astype(jnp.float32)


def init_params(key, obs_dim, num_actions, hidden=HIDDEN):
    # Mimics PyTorch nn.Linear default init: U(-1/sqrt(fan_in), 1/sqrt(fan_in)).
    def linear(key, fan_in, fan_out):
        kw, kb = jax.random.split(key)
        bound = 1.0 / jnp.sqrt(fan_in)
        w = jax.random.uniform(kw, (fan_in, fan_out), jnp.float32, -bound, bound)
        b = jax.random.uniform(kb, (1, fan_out), jnp.float32, -bound, bound)
        return w, b

    k1, k2, k3 = jax.random.split(key, 3)
    w1, b1 = linear(k1, obs_dim, hidden)
    w2, b2 = linear(k2, hidden, hidden)
    w3, b3 = linear(k3, hidden, num_actions)
    return (w1, b1, w2, b2, w3, b3)


def dqn_reference(x, params):
    w1, b1, w2, b2, w3, b3 = params
    h = jnp.maximum(x @ w1 + b1, 0.0)
    h = jnp.maximum(h @ w2 + b2, 0.0)
    return h @ w3 + b3


if __name__ == "__main__":
    batch, obs_dim, num_actions = 8, 8, 4

    key = jax.random.PRNGKey(0)
    k_obs, k_params, k_big = jax.random.split(key, 3)
    obs = jax.random.normal(k_obs, (batch, obs_dim), jnp.float32)
    params = init_params(k_params, obs_dim, num_actions)
    ref = dqn_reference(obs, params)

    # f32 path (exact vs reference); params prepared once, reused per call.
    prep_f32, A = prepare_params(params, use_bf16=False)
    out = jax.block_until_ready(dqn_forward(obs, prep_f32, A))
    assert out.shape == (batch, num_actions)
    assert jnp.allclose(out, ref, atol=1e-4, rtol=1e-4), "f32 mismatch vs reference"

    # bf16 weights/activations, f32 layer-3 accumulation, bf16 writeback.
    prep_bf16, _ = prepare_params(params, use_bf16=True)
    out_bf16 = jax.block_until_ready(dqn_forward(obs, prep_bf16, A, use_bf16=True))
    assert out_bf16.shape == (batch, num_actions)
    assert jnp.allclose(out_bf16, ref, atol=3e-2, rtol=3e-2), "bf16 mismatch vs reference"

    # Multi-tile batch (non-multiple of the tile) exercises the grid/padding path.
    big_batch = 40
    obs_big = jax.random.normal(k_big, (big_batch, obs_dim), jnp.float32)
    out_big = jax.block_until_ready(dqn_forward(obs_big, prep_f32, A, block_b=16))
    ref_big = dqn_reference(obs_big, params)
    assert out_big.shape == (big_batch, num_actions)
    assert jnp.allclose(out_big, ref_big, atol=1e-4, rtol=1e-4), "tiled mismatch vs reference"

    # Larger batch with the default (512) tile: forces >=2 tiles so the
    # "parallel" axis can split across v7x's two TensorCores.
    obs_huge = jax.random.normal(k_big, (1024, obs_dim), jnp.float32)
    out_huge = jax.block_until_ready(dqn_forward(obs_huge, prep_f32, A))
    ref_huge = dqn_reference(obs_huge, params)
    assert jnp.allclose(out_huge, ref_huge, atol=1e-4, rtol=1e-4), "big-batch mismatch"

    # TODO(synk): for tiny action-selection batches the call is launch/weight-DMA
    # bound; batch multiple timesteps per call or keep weights resident across
    # calls (cross-call prefetch) if that path dominates the RL loop.
    print("KERNEL_OK")
</pallas_src>

<mosaic_0001>
module attributes {stable_mosaic.version = 11 : i64} {
  func.func @dqn_kernel(%arg0: i32, %arg1: memref<8x8xf32, #tpu.memory_space<vmem>>, %arg2: memref<8x128xf32, #tpu.memory_space<vmem>>, %arg3: memref<1x128xf32, #tpu.memory_space<vmem>>, %arg4: memref<128x128xf32, #tpu.memory_space<vmem>>, %arg5: memref<1x128xf32, #tpu.memory_space<vmem>>, %arg6: memref<128x128xf32, #tpu.memory_space<vmem>>, %arg7: memref<1x128xf32, #tpu.memory_space<vmem>>, %arg8: memref<8x128xf32, #tpu.memory_space<vmem>>) attributes {dimension_semantics = [#tpu.dimension_semantics<parallel>], iteration_bounds = array<i64: 1>, scalar_prefetch = 0 : i64, scratch_operands = 0 : i64, tpu.core_type = #tpu.core_type<tc>, window_params = [{transform_indices = @transform_0, window_bounds = array<i64: 8, 8>}, {pipeline_mode = #tpu.pipeline_mode<synchronous>, transform_indices = @transform_1, window_bounds = array<i64: 8, 128>}, {pipeline_mode = #tpu.pipeline_mode<synchronous>, transform_indices = @transform_2, window_bounds = array<i64: 1, 128>}, {pipeline_mode = #tpu.pipeline_mode<synchronous>, transform_indices = @transform_3, window_bounds = array<i64: 128, 128>}, {pipeline_mode = #tpu.pipeline_mode<synchronous>, transform_indices = @transform_4, window_bounds = array<i64: 1, 128>}, {pipeline_mode = #tpu.pipeline_mode<synchronous>, transform_indices = @transform_5, window_bounds = array<i64: 128, 128>}, {pipeline_mode = #tpu.pipeline_mode<synchronous>, transform_indices = @transform_6, window_bounds = array<i64: 1, 128>}, {transform_indices = @transform_7, window_bounds = array<i64: 8, 128>}]} {
    %c0 = arith.constant 0 : index
    %c0_0 = arith.constant 0 : index
    %0 = vector.load %arg1[%c0, %c0_0] : memref<8x8xf32, #tpu.memory_space<vmem>>, vector<8x8xf32>
    %c0_1 = arith.constant 0 : index
    %c0_2 = arith.constant 0 : index
    %1 = vector.load %arg2[%c0_1, %c0_2] : memref<8x128xf32, #tpu.memory_space<vmem>>, vector<8x128xf32>
    %cst = arith.constant dense<0.000000e+00> : vector<8x128xf32>
    %2 = tpu.matmul %0, %1, %cst {dimension_numbers = #tpu.dot_dimension_numbers<[1], [0], [0], [1], [0, 0, 1, 1], [], []>} : vector<8x8xf32>, vector<8x128xf32>, vector<8x128xf32> -> vector<8x128xf32>
    %c0_3 = arith.constant 0 : index
    %c0_4 = arith.constant 0 : index
    %3 = vector.load %arg3[%c0_3, %c0_4] : memref<1x128xf32, #tpu.memory_space<vmem>>, vector<1x128xf32>
    %4 = vector.broadcast %3 : vector<1x128xf32> to vector<8x128xf32>
    %5 = arith.addf %2, %4 : vector<8x128xf32>
    %cst_5 = arith.constant 0.000000e+00 : f32
    %6 = vector.broadcast %cst_5 : f32 to vector<8x128xf32>
    %7 = arith.maximumf %5, %6 : vector<8x128xf32>
    %c0_6 = arith.constant 0 : index
    %c0_7 = arith.constant 0 : index
    %8 = vector.load %arg4[%c0_6, %c0_7] : memref<128x128xf32, #tpu.memory_space<vmem>>, vector<128x128xf32>
    %cst_8 = arith.constant dense<0.000000e+00> : vector<8x128xf32>
    %9 = tpu.matmul %7, %8, %cst_8 {dimension_numbers = #tpu.dot_dimension_numbers<[1], [0], [0], [1], [0, 0, 1, 1], [], []>} : vector<8x128xf32>, vector<128x128xf32>, vector<8x128xf32> -> vector<8x128xf32>
    %c0_9 = arith.constant 0 : index
    %c0_10 = arith.constant 0 : index
    %10 = vector.load %arg5[%c0_9, %c0_10] : memref<1x128xf32, #tpu.memory_space<vmem>>, vector<1x128xf32>
    %11 = vector.broadcast %10 : vector<1x128xf32> to vector<8x128xf32>
    %12 = arith.addf %9, %11 : vector<8x128xf32>
    %cst_11 = arith.constant 0.000000e+00 : f32
    %13 = vector.broadcast %cst_11 : f32 to vector<8x128xf32>
    %14 = arith.maximumf %12, %13 : vector<8x128xf32>
    %c0_12 = arith.constant 0 : index
    %c0_13 = arith.constant 0 : index
    %15 = vector.load %arg6[%c0_12, %c0_13] : memref<128x128xf32, #tpu.memory_space<vmem>>, vector<128x128xf32>
    %cst_14 = arith.constant dense<0.000000e+00> : vector<8x128xf32>
    %16 = tpu.matmul %14, %15, %cst_14 {dimension_numbers = #tpu.dot_dimension_numbers<[1], [0], [0], [1], [0, 0, 1, 1], [], []>} : vector<8x128xf32>, vector<128x128xf32>, vector<8x128xf32> -> vector<8x128xf32>
    %c0_15 = arith.constant 0 : index
    %c0_16 = arith.constant 0 : index
    %17 = vector.load %arg7[%c0_15, %c0_16] : memref<1x128xf32, #tpu.memory_space<vmem>>, vector<1x128xf32>
    %18 = vector.broadcast %17 : vector<1x128xf32> to vector<8x128xf32>
    %19 = arith.addf %16, %18 : vector<8x128xf32>
    %c0_17 = arith.constant 0 : index
    %c0_18 = arith.constant 0 : index
    %20 = vector.load %arg8[%c0_17, %c0_18] : memref<8x128xf32, #tpu.memory_space<vmem>>, vector<8x128xf32>
    tpu.vector_store %arg8[%c0_17, %c0_18], %19 {strides = array<i32>} : memref<8x128xf32, #tpu.memory_space<vmem>>, vector<8x128xf32>,
    return
  }
  func.func @transform_0(%arg0: i32) -> (i32, i32) {
    %c0_i32 = arith.constant 0 : i32
    %c0_i32_0 = arith.constant 0 : i32
    return %arg0, %c0_i32 : i32, i32
  }
  func.func @transform_1(%arg0: i32) -> (i32, i32) {
    %c0_i32 = arith.constant 0 : i32
    %c0_i32_0 = arith.constant 0 : i32
    %c0_i32_1 = arith.constant 0 : i32
    return %c0_i32, %c0_i32_0 : i32, i32
  }
  func.func @transform_2(%arg0: i32) -> (i32, i32) {
    %c0_i32 = arith.constant 0 : i32
    %c0_i32_0 = arith.constant 0 : i32
    %c0_i32_1 = arith.constant 0 : i32
    return %c0_i32, %c0_i32_0 : i32, i32
  }
  func.func @transform_3(%arg0: i32) -> (i32, i32) {
    %c0_i32 = arith.constant 0 : i32
    %c0_i32_0 = arith.constant 0 : i32
    %c0_i32_1 = arith.constant 0 : i32
    return %c0_i32, %c0_i32_0 : i32, i32
  }
  func.func @transform_4(%arg0: i32) -> (i32, i32) {
    %c0_i32 = arith.constant 0 : i32
    %c0_i32_0 = arith.constant 0 : i32
    %c0_i32_1 = arith.constant 0 : i32
    return %c0_i32, %c0_i32_0 : i32, i32
  }
  func.func @transform_5(%arg0: i32) -> (i32, i32) {
    %c0_i32 = arith.constant 0 : i32
    %c0_i32_0 = arith.constant 0 : i32
    %c0_i32_1 = arith.constant 0 : i32
    return %c0_i32, %c0_i32_0 : i32, i32
  }
  func.func @transform_6(%arg0: i32) -> (i32, i32) {
    %c0_i32 = arith.constant 0 : i32
    %c0_i32_0 = arith.constant 0 : i32
    %c0_i32_1 = arith.constant 0 : i32
    return %c0_i32, %c0_i32_0 : i32, i32
  }
  func.func @transform_7(%arg0: i32) -> (i32, i32) {
    %c0_i32 = arith.constant 0 : i32
    %c0_i32_0 = arith.constant 0 : i32
    return %arg0, %c0_i32 : i32, i32
  }
}

</mosaic_0001>

<bundles_post_ra>
// kernel: dqn_forward.1
= control target key start
LH: loop header
LB: loop body
LE: loop exit
PB: predicated region body
PF: predicated region fallthrough
CT: control target
= control target key end

     0   :  { %12 = vsyncpa [#allocation3], 0  ;;  %s387_s0 = inlined_call_operand.hbm [shape: f32[8,8], index: 0, kind: input, shape index: {}]   ;;  %s388_s1 = inlined_call_operand.hbm [shape: f32[8,128], index: 1, kind: input, shape index: {}]   ;;  %s389_s2 = inlined_call_operand.vmem [shape: f32[1,128], index: 2, kind: input, shape index: {}]   ;;  %s390_s3 = inlined_call_operand.hbm [shape: f32[128,128], index: 3, kind: input, shape index: {}]   ;;  %s391_s4 = inlined_call_operand.vmem [shape: f32[1,128], index: 4, kind: input, shape index: {}]   ;;  %s392_s5 = inlined_call_operand.hbm [shape: f32[128,128], index: 5, kind: input, shape index: {}]   ;;  %s393_s6 = inlined_call_operand.vmem [shape: f32[1,128], index: 6, kind: input, shape index: {}]   ;;  %s394_s7 = inlined_call_operand.vmem [shape: f32[8,128], index: 7, kind: output, shape index: {}]  }
   0x1   :  { %13 = vsyncpa [#allocation5], 0  ;;  %s31_s26 = sshll.u32 %s388_s1, 4  ;;  %s32_s26 = int_to_ptr.hbm [resolvable:$true] %s31_s26 }
   0x2   :  { %14 = vsyncpa [#allocation8], 0  ;;  %s317_s27 = smov [#allocation4]   ;;  %s20_s8 = sshll.u32 %s387_s0, 4  ;;  %s21_s8 = int_to_ptr.hbm [resolvable:$true] %s20_s8 }
   0x3   :  { %s33_s28 = sshll.u32 %s317_s27, 4  ;;  %s318_s9 = smov [#allocation2]   ;;  %s34_s28 = int_to_ptr.vmem [resolvable:$true] %s33_s28 }
   0x4   :  { %36 = dma.hbm_to_vmem [thread:$0]  %s32_s26, 128, %s34_s28, [#allocation5]  }
   0x5   :  { %s22_s10 = sshll.u32 %s318_s9, 4  ;;  %s43_s13 = sshll.u32 %s390_s3, 4  ;;  %s23_s10 = int_to_ptr.vmem [resolvable:$true] %s22_s10  ;;  %s44_s13 = int_to_ptr.hbm [resolvable:$true] %s43_s13 }
   0x6   :  { %25 = dma.hbm_to_vmem [thread:$0]  %s21_s8, 128, %s23_s10, [#allocation3]  }
   0x7   :  { %s319_s1 = smov [#allocation6]   ;;  %s58_s17 = sshll.u32 %s392_s5, 4  ;;  %s59_s17 = int_to_ptr.hbm [resolvable:$true] %s58_s17 }
   0x8   :  { %s45_s14 = sshll.u32 %s319_s1, 4  ;;  %s320_s18 = smov 128   ;;  %s46_s14 = int_to_ptr.vmem [resolvable:$true] %s45_s14 }
   0x9   :  { %s321_s0 = smov 8   ;;  %s322_s19 = smov [#allocation7]  }
   0xa   :  { %51 = dma.hbm_to_vmem [thread:$0]  %s44_s13, 2048, %s46_s14, [#allocation5], %s320_s18, %s320_s18, %s321_s0  }
   0xb   :  { %s60_s20 = sshll.u32 %s322_s19, 4  ;;  %s61_s20 = int_to_ptr.vmem [resolvable:$true] %s60_s20 }
   0xc   :  { %66 = dma.hbm_to_vmem [thread:$0]  %s59_s17, 2048, %s61_s20, [#allocation8], %s320_s18, %s320_s18, %s321_s0  }
   0xd   :  { %311 = dma.done.wait [#allocation3], 128  }
   0xe   :  { %312 = vsyncadd [#allocation3], 4294967168 }
   0xf   :  { %313 = dma.done.wait [#allocation5], 2176  }
  0x10   :  { %314 = vsyncadd [#allocation5], 4294965120 }
  0x11   :  { %315 = dma.done.wait [#allocation8], 2048  }
  0x12   :  { %316 = vsyncadd [#allocation8], 4294965248  ;;  %vm91_vm0 = vcmask 64512   ;;  %v86_v0 = vld [vmem:[#allocation4] sm:$0xff]  ;;  %v85_v1 = vld [vmem:[#allocation2] sm:$0xff] }
  0x13   :  { %v131_v2 = vld [vmem:[#allocation6 + $0x78] sm:$0xff]  ;;  %110 = vmatpush.msra.mxu0 %v86_v0  ;;  %v130_v3 = vld [vmem:[#allocation6 + $0x70] sm:$0xff]  ;;  %v129_v4 = vld [vmem:[#allocation6 + $0x68] sm:$0xff] }
  0x14   :  { %136 = vmatpush.msra.mxu1 %v131_v2  ;;  %205 = vmatmul.msk.f32.vlgmr.msra.gmra.mxu0 %vm91_vm0, %v85_v1  ;;  %v128_v5 = vld [vmem:[#allocation6 + $0x60] sm:$0xff]  ;;  %v127_v6 = vld [vmem:[#allocation6 + $0x58] sm:$0xff]  ;;  %v126_v7 = vld [vmem:[#allocation6 + $0x50] sm:$0xff] }
  0x15   :  { %v125_v8 = vld [vmem:[#allocation6 + $0x48] sm:$0xff]  ;;  %v124_v9 = vld [vmem:[#allocation6 + $0x40] sm:$0xff]  ;;  %v123_v10 = vld [vmem:[#allocation6 + $0x38] sm:$0xff] }
  0x16   :  { %137 = vmatpush.msra.mxu1 %v130_v3  ;;  %v122_v11 = vld [vmem:[#allocation6 + $0x30] sm:$0xff]  ;;  %v121_v12 = vld [vmem:[#allocation6 + $0x28] sm:$0xff]  ;;  %v120_v13 = vld [vmem:[#allocation6 + $0x20] sm:$0xff] }
  0x17   :  { %v119_v14 = vld [vmem:[#allocation6 + $0x18] sm:$0xff]  ;;  %v118_v15 = vld [vmem:[#allocation6 + $0x10] sm:$0xff]  ;;  %v117_v16 = vld [vmem:[#allocation6 + $0x8] sm:$0xff] }
  0x18   :  { %138 = vmatpush.msra.mxu1 %v129_v4  ;;  %v116_v17 = vld [vmem:[#allocation6] sm:$0xff]  ;;  %v172_v18 = vld [vmem:[#allocation7 + $0x78] sm:$0xff]  ;;  %v171_v19 = vld [vmem:[#allocation7 + $0x70] sm:$0xff] }
  0x19   :  { %177 = vmatpush.msra.mxu2 %v172_v18  ;;  %v170_v20 = vld [vmem:[#allocation7 + $0x68] sm:$0xff]  ;;  %v169_v21 = vld [vmem:[#allocation7 + $0x60] sm:$0xff]  ;;  %v168_v22 = vld [vmem:[#allocation7 + $0x58] sm:$0xff] }
  0x1a   :  { %139 = vmatpush.msra.mxu1 %v128_v5  ;;  %v167_v23 = vld [vmem:[#allocation7 + $0x50] sm:$0xff]  ;;  %v166_v24 = vld [vmem:[#allocation7 + $0x48] sm:$0xff]  ;;  %v165_v25 = vld [vmem:[#allocation7 + $0x40] sm:$0xff] }
  0x1b   :  { %178 = vmatpush.msra.mxu2 %v171_v19  ;;  %v164_v26 = vld [vmem:[#allocation7 + $0x38] sm:$0xff]  ;;  %v163_v27 = vld [vmem:[#allocation7 + $0x30] sm:$0xff]  ;;  %v162_v28 = vld [vmem:[#allocation7 + $0x28] sm:$0xff] }
  0x1c   :  { %140 = vmatpush.msra.mxu1 %v127_v6  ;;  %v161_v29 = vld [vmem:[#allocation7 + $0x20] sm:$0xff]  ;;  %v160_v30 = vld [vmem:[#allocation7 + $0x18] sm:$0xff]  ;;  %v212_v31 = vld [vmem:[%s389_s2] ss:$0 sm:$0xff] }
  0x1d   :  { %179 = vmatpush.msra.mxu2 %v170_v20  ;;  %v159_v35 = vld [vmem:[#allocation7 + $0x10] sm:$0xff]  ;;  %v158_v36 = vld [vmem:[#allocation7 + $0x8] sm:$0xff]  ;;  %v157_v37 = vld [vmem:[#allocation7] sm:$0xff] }
  0x1e   :  { %141 = vmatpush.msra.mxu1 %v126_v7  ;;  %v213_v38 = vld [vmem:[%s391_s4] ss:$0 sm:$0xff] }
  0x1f   :  { %180 = vmatpush.msra.mxu2 %v169_v21  ;;  %v214_v42 = vld [vmem:[%s393_s6] ss:$0 sm:$0xff] }
  0x20   :  { %142 = vmatpush.msra.mxu1 %v125_v8 }
  0x21   :  { %181 = vmatpush.msra.mxu2 %v168_v22 }
  0x22   :  { %143 = vmatpush.msra.mxu1 %v124_v9 }
  0x23   :  { %182 = vmatpush.msra.mxu2 %v167_v23 }
  0x24   :  { %144 = vmatpush.msra.mxu1 %v123_v10 }
  0x25   :  { %183 = vmatpush.msra.mxu2 %v166_v24 }
  0x26   :  { %145 = vmatpush.msra.mxu1 %v122_v11 }
  0x27   :  { %184 = vmatpush.msra.mxu2 %v165_v25 }
  0x28   :  { %146 = vmatpush.msra.mxu1 %v121_v12 }
  0x29   :  { %185 = vmatpush.msra.mxu2 %v164_v26 }
  0x2a   :  { %147 = vmatpush.msra.mxu1 %v120_v13 }
  0x2b   :  { %186 = vmatpush.msra.mxu2 %v163_v27 }
  0x2c   :  { %148 = vmatpush.msra.mxu1 %v119_v14 }
  0x2d   :  { %187 = vmatpush.msra.mxu2 %v162_v28 }
  0x2e   :  { %149 = vmatpush.msra.mxu1 %v118_v15 }
  0x2f   :  { %188 = vmatpush.msra.mxu2 %v161_v29 }
  0x30   :  { %150 = vmatpush.msra.mxu1 %v117_v16 }
  0x31   :  { %189 = vmatpush.msra.mxu2 %v160_v30 }
  0x32   :  { %151 = vmatpush.msra.mxu1 %v116_v17 }
  0x33   :  { %190 = vmatpush.msra.mxu2 %v159_v35 }
  0x35   :  { %191 = vmatpush.msra.mxu2 %v158_v36 }
  0x37   :  { %192 = vmatpush.msra.mxu2 %v157_v37 }
  0x91   :  { %v112_v32 = vpop.f32.mrf.mxu0 }
  0x92   :  { %v113_v33 = vadd.f32 %v212_v31, %v112_v32 }
  0x94   :  { %v115_v34 = vmax.f32 %v113_v33, 0.0 }
  0x96   :  { %152 = vmatmul.f32.vlgmr.msra.gmra.mxu1 %v115_v34 }
 0x113   :  { %v153_v39 = vpop.f32.mrf.mxu1 }
 0x114   :  { %v154_v40 = vadd.f32 %v213_v38, %v153_v39 }
 0x116   :  { %v156_v41 = vmax.f32 %v154_v40, 0.0 }
 0x118   :  { %193 = vmatmul.f32.vlgmr.msra.gmra.mxu2 %v156_v41 }
 0x19b   :  { %v194_v43 = vpop.f32.mrf.mxu2 }
 0x19c   :  { %v195_v44 = vadd.f32 %v214_v42, %v194_v43 }
 0x19e   :  { %197 = vst [vmem:[%s394_s7] sm:$0xff] %v195_v44 }
 0x19f   :  { %202 = vsyncpa [#allocation3], 1 }
 0x1a0   :  { %203 = vsyncpa [#allocation5], 1 }
 0x1a1   :  { %204 = vsyncpa [#allocation8], 1 }

</bundles_post_ra>
